<compile_context>
chip_gen: v7x
topology: tpu7x:2x2x1
jax: 0.10.0
libtpu: 0.0.40
codegen_flags: <defaults>
</compile_context>

<pallas_src>
import functools

import jax
import jax.numpy as jnp
from jax.experimental import pallas as pl
from jax.experimental.pallas import tpu as pltpu

LANE = 128                       # lane width (used only for VMEM budgeting)
SUBLANE_BF16 = 16                # bf16 native sublane tile
COMPUTE_DTYPE = jnp.bfloat16     # MXU input dtype; accumulation is f32
VMEM_BUDGET_BYTES = 48 * 1024 * 1024   # safe on v7x (64 MiB/TC) and v5e/v6e


def _round_up(x, m):
    return (x + m - 1) // m * m


# ---------------------------------------------------------------------------
# Fused kernel: all layers chained inside one body.
# Ref order: x tile, (w0, b0, w1, b1, ...), out tile.
# ---------------------------------------------------------------------------
def _fcnet_fused_kernel(n_layers, x_ref, *rest):
    o_ref = rest[-1]
    wb_refs = rest[:-1]

    # bf16 cast happens here (in-VMEM), not in the wrapper.
    h = x_ref[...].astype(COMPUTE_DTYPE)              # (tm, in_dim)
    for l in range(n_layers):
        w_ref = wb_refs[2 * l]                        # (in_l, out_l) bf16, scale folded
        b_ref = wb_refs[2 * l + 1]                    # (1, out_l)    f32
        # MXU matmul with f32 accumulation; bias + ReLU epilogue in f32 (VPU).
        y = jnp.dot(h, w_ref[...], preferred_element_type=jnp.float32)
        y = jnp.maximum(y + b_ref[...], 0.0)
        # Re-cast to bf16 only if another matmul follows.
        h = y.astype(COMPUTE_DTYPE) if l + 1 < n_layers else y

    o_ref[...] = h.astype(o_ref.dtype)


# ---------------------------------------------------------------------------
# Parameter setup (plain JAX, one-time — not in the forward hot path)
# ---------------------------------------------------------------------------
def init_fcnet_params(key, dims):
    """Weight-norm'd Linear params per layer: (v, g, b).
    v is stored as [in_dim, out_dim] (PyTorch W.T).  g is deliberately NOT
    equal to ||v||_F so the weight-norm scale path (s != 1) is exercised."""
    params = []
    for i in range(len(dims) - 1):
        key, kv, kg, kb = jax.random.split(key, 4)
        in_dim, out_dim = dims[i], dims[i + 1]
        v = jax.random.normal(kv, (in_dim, out_dim), jnp.float32) * 0.1
        g = jnp.sqrt(jnp.sum(v * v)) * jax.random.uniform(
            kg, (), jnp.float32, 0.5, 1.5)
        b = jax.random.normal(kb, (out_dim,), jnp.float32) * 0.01
        params.append((v, g, b))
    return params


def prepare_fcnet_params(params):
    """Fold the weight_norm(dim=None) scale s = g / ||v||_F into the weights,
    cast to the MXU compute dtype, keep biases f32.  No feature padding."""
    prepared = []
    for v, g, b in params:
        s = g / jnp.sqrt(jnp.sum(v * v))
        w = (v * s).astype(COMPUTE_DTYPE)             # (in_dim, out_dim) bf16
        bb = b.reshape(1, -1).astype(jnp.float32)     # (1, out_dim)      f32
        prepared.append((w, bb))
    return prepared


# ---------------------------------------------------------------------------
# M-tiling: adaptive tile, VMEM-budgeted, >=2 grid steps for v7x megacore.
# ---------------------------------------------------------------------------
def _choose_m_tiling(M, tile_m_max, in_dim, out_dim, weight_bytes, budget):
    # VMEM footprint per row: double-buffered x tile (f32, lane-padded) +
    # double-buffered out tile (f32, lane-padded).
    row_bytes = 2 * _round_up(in_dim, LANE) * 4 + 2 * _round_up(out_dim, LANE) * 4
    avail = max(budget - 2 * weight_bytes, row_bytes * SUBLANE_BF16)
    tm_cap = max((avail // row_bytes) // SUBLANE_BF16 * SUBLANE_BF16, SUBLANE_BF16)
    tm_max = max(min(tile_m_max, tm_cap), SUBLANE_BF16)

    n_steps = pl.cdiv(M, tm_max)
    if n_steps == 1 and M > SUBLANE_BF16:
        n_steps = 2                       # let both v7x TensorCores take half of M
    tm = _round_up(pl.cdiv(M, n_steps), SUBLANE_BF16)
    return tm, n_steps, n_steps * tm


# ---------------------------------------------------------------------------
# Forward pass: one fused pallas_call over an M-tiled "parallel" grid.
# ---------------------------------------------------------------------------
def fcnet_forward(x, prepared, tile_m=4096):
    """x: [batch, seq, in_dim] -> [batch, seq, out_dim]  (dropout=0, ReLU)."""
    n_layers = len(prepared)
    batch, seq, in_dim = x.shape
    out_dim = prepared[-1][0].shape[1]
    M = batch * seq

    weight_bytes = sum(w.size * w.dtype.itemsize + b.size * b.dtype.itemsize
                       for w, b in prepared)
    tm, n_steps, m_pad = _choose_m_tiling(
        M, tile_m, in_dim, out_dim, weight_bytes, VMEM_BUDGET_BYTES)

    # No feature padding, no dtype cast: just flatten (and pad a handful of
    # rows only when M doesn't divide the adaptive tile).
    x2 = x.reshape(M, in_dim)
    if m_pad != M:
        x2 = jnp.pad(x2, ((0, m_pad - M), (0, 0)))

    in_specs = [pl.BlockSpec((tm, in_dim), lambda i: (i, 0))]   # walked along M
    flat_inputs = [x2]
    for w, b in prepared:
        # grid-invariant full-extent blocks -> VMEM-resident across all steps
        in_specs.append(pl.BlockSpec(w.shape, lambda i: (0, 0)))
        in_specs.append(pl.BlockSpec(b.shape, lambda i: (0, 0)))
        flat_inputs += [w, b]

    out = pl.pallas_call(
        functools.partial(_fcnet_fused_kernel, n_layers),
        out_shape=jax.ShapeDtypeStruct((m_pad, out_dim), jnp.float32),
        grid_spec=pltpu.PrefetchScalarGridSpec(
            num_scalar_prefetch=0,
            grid=(n_steps,),
            in_specs=in_specs,
            out_specs=pl.BlockSpec((tm, out_dim), lambda i: (i, 0)),
        ),
        compiler_params=pltpu.CompilerParams(
            # M tiles are independent -> megacore-shardable on v7x.
            dimension_semantics=("parallel",),
            vmem_limit_bytes=VMEM_BUDGET_BYTES,
        ),
    )(*flat_inputs)

    if m_pad != M:
        out = out[:M]
    return out.reshape(batch, seq, out_dim)


# ---------------------------------------------------------------------------
# Plain-JAX reference mirroring the kernel numerics (bf16 MXU inputs, f32 acc,
# scale folded into the bf16 weights, ReLU after every layer incl. the last).
# ---------------------------------------------------------------------------
def fcnet_reference(x, params):
    h = x.astype(jnp.float32)
    for v, g, b in params:
        s = g / jnp.sqrt(jnp.sum(v * v))
        w = (v * s).astype(COMPUTE_DTYPE)
        y = jnp.dot(h.astype(COMPUTE_DTYPE), w, preferred_element_type=jnp.float32)
        h = jnp.maximum(y + b, 0.0)
    return h


if __name__ == "__main__":
    key = jax.random.PRNGKey(0)
    dims = (32, 64, 32)            # FCNet([32, 64, 32], act='ReLU', dropout=0)
    batch, seq = 2, 8

    key, kx = jax.random.split(key)
    x = jax.random.normal(kx, (batch, seq, dims[0]), jnp.float32)
    params = init_fcnet_params(key, dims)
    prepared = prepare_fcnet_params(params)

    fwd = jax.jit(fcnet_forward, static_argnames=("tile_m",))
    out = jax.block_until_ready(fwd(x, prepared, tile_m=4096))

    ref = fcnet_reference(x, params)
    assert out.shape == (batch, seq, dims[-1])
    assert jnp.allclose(out, ref, atol=2e-3, rtol=2e-3), "mismatch vs reference"

    print("KERNEL_OK")
</pallas_src>

<mosaic_0001>
module attributes {stable_mosaic.version = 11 : i64} {
  func.func @_fcnet_fused_kernel(%arg0: i32, %arg1: memref<16x32xf32, #tpu.memory_space<vmem>>, %arg2: memref<32x64xbf16, #tpu.memory_space<vmem>>, %arg3: memref<1x64xf32, #tpu.memory_space<vmem>>, %arg4: memref<64x32xbf16, #tpu.memory_space<vmem>>, %arg5: memref<1x32xf32, #tpu.memory_space<vmem>>, %arg6: memref<16x32xf32, #tpu.memory_space<vmem>>) attributes {dimension_semantics = [#tpu.dimension_semantics<parallel>], iteration_bounds = array<i64: 1>, scalar_prefetch = 0 : i64, scratch_operands = 0 : i64, tpu.core_type = #tpu.core_type<tc>, window_params = [{transform_indices = @transform_0, window_bounds = array<i64: 16, 32>}, {pipeline_mode = #tpu.pipeline_mode<synchronous>, transform_indices = @transform_1, window_bounds = array<i64: 32, 64>}, {pipeline_mode = #tpu.pipeline_mode<synchronous>, transform_indices = @transform_2, window_bounds = array<i64: 1, 64>}, {pipeline_mode = #tpu.pipeline_mode<synchronous>, transform_indices = @transform_3, window_bounds = array<i64: 64, 32>}, {pipeline_mode = #tpu.pipeline_mode<synchronous>, transform_indices = @transform_4, window_bounds = array<i64: 1, 32>}, {transform_indices = @transform_5, window_bounds = array<i64: 16, 32>}]} {
    %c0 = arith.constant 0 : index
    %c0_0 = arith.constant 0 : index
    %0 = vector.load %arg1[%c0, %c0_0] : memref<16x32xf32, #tpu.memory_space<vmem>>, vector<16x32xf32>
    %1 = arith.truncf %0 : vector<16x32xf32> to vector<16x32xbf16>
    %c0_1 = arith.constant 0 : index
    %c0_2 = arith.constant 0 : index
    %2 = vector.load %arg2[%c0_1, %c0_2] : memref<32x64xbf16, #tpu.memory_space<vmem>>, vector<32x64xbf16>
    %cst = arith.constant dense<0.000000e+00> : vector<16x64xf32>
    %3 = tpu.matmul %1, %2, %cst {dimension_numbers = #tpu.dot_dimension_numbers<[1], [0], [0], [1], [0, 0, 1, 1], [], []>} : vector<16x32xbf16>, vector<32x64xbf16>, vector<16x64xf32> -> vector<16x64xf32>
    %c0_3 = arith.constant 0 : index
    %c0_4 = arith.constant 0 : index
    %4 = vector.load %arg3[%c0_3, %c0_4] : memref<1x64xf32, #tpu.memory_space<vmem>>, vector<1x64xf32>
    %5 = vector.broadcast %4 : vector<1x64xf32> to vector<16x64xf32>
    %6 = arith.addf %3, %5 : vector<16x64xf32>
    %cst_5 = arith.constant 0.000000e+00 : f32
    %7 = vector.broadcast %cst_5 : f32 to vector<16x64xf32>
    %8 = arith.maximumf %6, %7 : vector<16x64xf32>
    %9 = arith.truncf %8 : vector<16x64xf32> to vector<16x64xbf16>
    %c0_6 = arith.constant 0 : index
    %c0_7 = arith.constant 0 : index
    %10 = vector.load %arg4[%c0_6, %c0_7] : memref<64x32xbf16, #tpu.memory_space<vmem>>, vector<64x32xbf16>
    %cst_8 = arith.constant dense<0.000000e+00> : vector<16x32xf32>
    %11 = tpu.matmul %9, %10, %cst_8 {dimension_numbers = #tpu.dot_dimension_numbers<[1], [0], [0], [1], [0, 0, 1, 1], [], []>} : vector<16x64xbf16>, vector<64x32xbf16>, vector<16x32xf32> -> vector<16x32xf32>
    %c0_9 = arith.constant 0 : index
    %c0_10 = arith.constant 0 : index
    %12 = vector.load %arg5[%c0_9, %c0_10] : memref<1x32xf32, #tpu.memory_space<vmem>>, vector<1x32xf32>
    %13 = vector.broadcast %12 : vector<1x32xf32> to vector<16x32xf32>
    %14 = arith.addf %11, %13 : vector<16x32xf32>
    %cst_11 = arith.constant 0.000000e+00 : f32
    %15 = vector.broadcast %cst_11 : f32 to vector<16x32xf32>
    %16 = arith.maximumf %14, %15 : vector<16x32xf32>
    %c0_12 = arith.constant 0 : index
    %c0_13 = arith.constant 0 : index
    %17 = vector.load %arg6[%c0_12, %c0_13] : memref<16x32xf32, #tpu.memory_space<vmem>>, vector<16x32xf32>
    tpu.vector_store %arg6[%c0_12, %c0_13], %16 {strides = array<i32>} : memref<16x32xf32, #tpu.memory_space<vmem>>, vector<16x32xf32>,
    return
  }
  func.func @transform_0(%arg0: i32) -> (i32, i32) {
    %c0_i32 = arith.constant 0 : i32
    %c0_i32_0 = arith.constant 0 : i32
    return %arg0, %c0_i32 : i32, i32
  }
  func.func @transform_1(%arg0: i32) -> (i32, i32) {
    %c0_i32 = arith.constant 0 : i32
    %c0_i32_0 = arith.constant 0 : i32
    %c0_i32_1 = arith.constant 0 : i32
    return %c0_i32, %c0_i32_0 : i32, i32
  }
  func.func @transform_2(%arg0: i32) -> (i32, i32) {
    %c0_i32 = arith.constant 0 : i32
    %c0_i32_0 = arith.constant 0 : i32
    %c0_i32_1 = arith.constant 0 : i32
    return %c0_i32, %c0_i32_0 : i32, i32
  }
  func.func @transform_3(%arg0: i32) -> (i32, i32) {
    %c0_i32 = arith.constant 0 : i32
    %c0_i32_0 = arith.constant 0 : i32
    %c0_i32_1 = arith.constant 0 : i32
    return %c0_i32, %c0_i32_0 : i32, i32
  }
  func.func @transform_4(%arg0: i32) -> (i32, i32) {
    %c0_i32 = arith.constant 0 : i32
    %c0_i32_0 = arith.constant 0 : i32
    %c0_i32_1 = arith.constant 0 : i32
    return %c0_i32, %c0_i32_0 : i32, i32
  }
  func.func @transform_5(%arg0: i32) -> (i32, i32) {
    %c0_i32 = arith.constant 0 : i32
    %c0_i32_0 = arith.constant 0 : i32
    return %arg0, %c0_i32 : i32, i32
  }
}

</mosaic_0001>

<bundles_post_ra>
// kernel: fcnet_forward.1
= control target key start
LH: loop header
LB: loop body
LE: loop exit
PB: predicated region body
PF: predicated region fallthrough
CT: control target
= control target key end

     0   :  { %v273_v1 = vmov 0.0   ;;  %vm274_vm0 = vmmov 0   ;;  %vm48_vm1 = vcmask 261120   ;;  %s353_s0 = inlined_call_operand.vmem [shape: f32[16,32], index: 0, kind: input, shape index: {}]   ;;  %s354_s1 = inlined_call_operand.vmem [shape: bf16[32,64], index: 1, kind: input, shape index: {}]   ;;  %s355_s2 = inlined_call_operand.vmem [shape: f32[1,64], index: 2, kind: input, shape index: {}]   ;;  %s356_s3 = inlined_call_operand.vmem [shape: bf16[64,32], index: 3, kind: input, shape index: {}]   ;;  %s357_s4 = inlined_call_operand.vmem [shape: f32[1,32], index: 4, kind: input, shape index: {}]   ;;  %s358_s5 = inlined_call_operand.hbm [shape: f32[16,32], index: 5, kind: output, shape index: {}]  }
   0x1   :  { %v243_v0 = vld [vmem:[%s354_s1] sm:$0xff]   ;;  %218 = vmatprep.subr.bf16.mxu0 %v273_v1  ;;  %v244_v2 = vld [vmem:[%s354_s1 + $0x8] sm:$0xff]   ;;  %226 = vmatprep.subr.bf16.mxu1 %v273_v1 }
   0x2   :  { %219 = vmatpush3.bf16.msra.mxu0 %v243_v0  ;;  %222 = vmatprep.mubr.msk.bf16.mxu0 %vm274_vm0, %v273_v1  ;;  %v22_v3 = vld [vmem:[%s353_s0] sm:$0xff]  ;;  %v23_v4 = vld [vmem:[%s353_s0 + $0x8] sm:$0xff] }
   0x3   :  { %220 = vmatprep.subr.bf16.mxu0 %v273_v1  ;;  %v245_v5 = vld [vmem:[%s356_s3] sm:$0xff]   ;;  %234 = vmatprep.mubr.msk.bf16.mxu1 %vm274_vm0, %v273_v1  ;;  %v246_v6 = vld [vmem:[%s356_s3 + $0x8] sm:$0xff]   ;;  %v24_v7 = vpack.c.bf16 %v23_v4, %v22_v3 }
   0x4   :  { %227 = vmatpush3.bf16.msra.mxu1 %v245_v5 }
   0x5   :  { %228 = vmatprep.subr.bf16.mxu1 %v273_v1 }
   0x6   :  { %221 = vmatpush3.bf16.msra.mxu0 %v244_v2 }
   0x7   :  { %10 = vsyncpa [#allocation3], 0  ;;  %v247_v8 = vld [vmem:[%s356_s3 + $0x10] sm:$0xff]   ;;  %v248_v9 = vld [vmem:[%s356_s3 + $0x18] sm:$0xff]   ;;  %vm135_vm2 = vcmask 523264   ;;  %s275_s3 = smov [#allocation2]  }
   0x8   :  { %229 = vmatpush3.bf16.msra.mxu1 %v246_v6  ;;  %v200_v10 = vld [vmem:[%s355_s2] ss:$0 sm:$0xff]  ;;  %s189_s2 = sshll.u32 %s275_s3, 4  ;;  %s190_s2 = int_to_ptr.vmem [resolvable:$true] %s189_s2 }
   0x9   :  { %223 = vmatmul.mubr.msk.bf16.vlgmr.msra.gmra.mrb[0].mxu0 %vm48_vm1, %v24_v7  ;;  %230 = vmatprep.subr.bf16.mxu1 %v273_v1  ;;  %v204_v20 = vld [vmem:[%s357_s4] ss:$0 sm:$0xff]  ;;  %s249_s11 = scalar_lea.vmem %s190_s2, 256  ;;  %p254_p1 = scmp.lt.s32.totalorder %s190_s2, %s190_s2 }
   0xa   :  { %p250_p0 = scmp.ne.s32.totalorder %s190_s2, %s249_s11  ;;  %p255_p2 = scmp.lt.s32.totalorder %s249_s11, %s249_s11 }
   0xc   :  { %231 = vmatpush3.bf16.msra.mxu1 %v247_v8  ;;  %p256_p3 = por %p255_p2, %p254_p1 }
   0xd   :  { %232 = vmatprep.subr.bf16.mxu1 %v273_v1 }
   0xe   :  { %p257_p4 = pnand %p256_p3, %p250_p0 }
  0x10   :  { %233 = vmatpush3.bf16.msra.mxu1 %v248_v9 }
  0xdc   :  { %v86_v11 = vpop.f32.mrb[0].mxu0 }
  0xdd   :  { %v87_v12 = vadd.f32 %v200_v10, %v86_v11  ;;  %v224_v13 = vpop.f32.mrb[1].mxu0 }
  0xde   :  { %v89_v14 = vpop.f32.mrb[2].mxu0 }
  0xdf   :  { %v90_v15 = vadd.f32 %v200_v10, %v89_v14  ;;  %v225_v16 = vpop.f32.mrb[3].mxu0  ;;  %v93_v17 = vmax.f32 %v87_v12, 0.0 }
  0xe1   :  { %v94_v18 = vmax.f32 %v90_v15, 0.0 }
  0xe3   :  { %v95_v19 = vpack.c.bf16 %v94_v18, %v93_v17 }
  0xe5   :  { %235 = vmatmul.mubr.msk.bf16.vlgmr.msra.gmra.mrb[0].mxu1 %vm135_vm2, %v95_v19 }
 0x1b8   :  { %v173_v21 = vpop.f32.mrb[0].mxu1 }
 0x1b9   :  { %v174_v22 = vadd.f32 %v204_v20, %v173_v21  ;;  %v236_v23 = vpop.f32.mrb[1].mxu1 }
 0x1ba   :  { %v176_v24 = vpop.f32.mrb[2].mxu1 }
 0x1bb   :  { %v180_v25 = vmax.f32 %v174_v22, 0.0  ;;  %v177_v26 = vadd.f32 %v204_v20, %v176_v24  ;;  %v237_v27 = vpop.f32.mrb[3].mxu1 }
 0x1bd   :  { %182 = vst.msk [vmem:[#allocation2] sm:$0xff] %vm48_vm1, %v180_v25  ;;  %v181_v28 = vmax.f32 %v177_v26, 0.0 }
 0x1bf   :  { %183 = vst.msk [vmem:[#allocation2 + $0x8] sm:$0xff] %vm48_vm1, %v181_v28 }
 0x1c0   :  { %260 = shalt.err (!%p257_p4)
}
 0x1c1   :  { %s261_s13 = scalar_lea.hbm %s358_s5, 256 }
 0x1c2   :  { %p262_p5 = scmp.ne.s32.totalorder %s358_s5, %s261_s13  ;;  %p265_p6 = scmp.lt.u32.totalorder %s261_s13, %s358_s5 }
 0x1c4   :  { %p267_p7 = pnand %p265_p6, %p262_p5 }
 0x1c6   :  { %270 = shalt.err (!%p267_p7)
}
 0x1c7   :  { %s276_s18 = smov 128   ;;  %s277_s19 = smov 8  }
 0x1c8   :  { %195 = dma.vmem_to_hbm [thread:$0]  %s190_s2, 256, %s358_s5, [#allocation3], %s276_s18, %s276_s18, %s277_s19  }
 0x1c9   :  { %271 = dma.done.wait [#allocation3], 256  }
 0x1ca   :  { %272 = vsyncadd [#allocation3], 4294967040 }
 0x1cb   :  { %199 = vsyncpa [#allocation3], 1 }

</bundles_post_ra>
